<compile_context>
chip_gen: v7x
topology: tpu7x:2x2x1
jax: 0.10.0
libtpu: 0.0.40
codegen_flags: <defaults>
</compile_context>

<pallas_src>
import jax
import jax.numpy as jnp
from jax.experimental import pallas as pl
from jax.experimental.pallas import tpu as pltpu

LANE = 128      # lane width (last dim)
SUBLANE = 8     # sublane width (second-to-last dim), f32


def _round_up(n, m):
    return ((n + m - 1) // m) * m


def _vmem_budget_bytes():
    """Conservative per-call VMEM budget (fits default scoped limits)."""
    try:
        cap = int(pltpu.get_tpu_info().vmem_capacity_bytes)
    except Exception:
        cap = 128 << 20
    return max(4 << 20, cap // 8)   # 16 MiB on v5e/v6e, 8 MiB on v7x


def mlp_kernel(x_ref, w1_ref, b1_ref, w2_ref, b2_ref, o_ref):
    # fc1: [Bt, I] @ [I, Hp] + [1, Hp]  (f32 MXU accumulation)
    h = jnp.dot(x_ref[...], w1_ref[...], preferred_element_type=jnp.float32)
    # bias + ReLU on the f32 accumulator (VPU)
    h = jnp.maximum(h + b1_ref[...], 0.0)
    # fc2: [Bt, Hp] @ [Hp, O] + [1, O]
    out = jnp.dot(h.astype(w2_ref.dtype), w2_ref[...],
                  preferred_element_type=jnp.float32)
    o_ref[...] = (out + b2_ref[...]).astype(o_ref.dtype)


def prepare_params(w1, b1, w2, b2):
    """One-time param prep (call ONCE, outside the forward path).

    Pads the hidden (lane) axis of w1/b1 and the hidden (sublane) axis of w2
    to a multiple of 128. Zero padding is exact: padded hidden units are
    ReLU(0 + 0) = 0 and multiply zero rows of w2. The input axis I and the
    output axis O are left unpadded (full-dim blocks are legal; a masked
    store of a narrow output block beats padding + a post-kernel slice).
    """
    H = w1.shape[1]
    Hp = _round_up(H, LANE)
    if Hp != H:
        w1 = jnp.pad(w1, ((0, 0), (0, Hp - H)))
        b1 = jnp.pad(b1, ((0, 0), (0, Hp - H)))
        w2 = jnp.pad(w2, ((0, Hp - H), (0, 0)))
    return w1, b1, w2, b2


def neural_net_forward(x, w1, b1, w2, b2, *, gridfree_row_limit=None):
    """Pallas forward for NeuralNet: fc1 -> ReLU -> fc2.

    x:  [B, num_input]                     float32 (or bf16 for bandwidth)
    w1: [num_input, Hp]                    (prepare_params output)
    b1: [1, Hp]
    w2: [Hp, num_output]
    b2: [1, num_output]
    """
    B, I = x.shape
    Hp = w1.shape[1]
    O = w2.shape[1]
    dtype = x.dtype
    itemsize = jnp.dtype(dtype).itemsize

    assert w1.shape[0] == I and w2.shape[0] == Hp
    assert b1.shape == (1, Hp) and b2.shape == (1, O)

    weight_bytes = (I * Hp + Hp + Hp * O + O) * itemsize
    # Per batch row: x row + out row (storage dtype) + hidden activations (f32).
    per_row_bytes = (I + O) * itemsize + Hp * 4
    budget = _vmem_budget_bytes()

    # Advisory scheduling hint with true dims.
    cost = pl.CostEstimate(
        flops=2 * B * (I * Hp + Hp * O),
        transcendentals=0,
        bytes_accessed=itemsize * (B * I + I * Hp + Hp + Hp * O + O + B * O))

    if gridfree_row_limit is None:
        gridfree_row_limit = max(SUBLANE, (budget - weight_bytes) // per_row_bytes)

    if B <= gridfree_row_limit:
        # Grid-free: everything VMEM-resident, single body invocation, no
        # pipeline prologue/epilogue, no padding, no post-kernel slice.
        return pl.pallas_call(
            mlp_kernel,
            out_shape=jax.ShapeDtypeStruct((B, O), dtype),
            in_specs=[pl.BlockSpec(memory_space=pltpu.MemorySpace.VMEM)] * 5,
            out_specs=pl.BlockSpec(memory_space=pltpu.MemorySpace.VMEM),
            cost_estimate=cost,
        )(x, w1, b1, w2, b2)

    # --- Batch-tiled path ---
    # Pick an even number of tiles (keeps the grid splittable across v7x's
    # 2 TensorCores; neutral on v5e/v6e) and grow it only until a tile fits
    # the VMEM budget with double-buffered x/out blocks + resident weights.
    # tile_b is rounded to the sublane granularity, so batch padding is at
    # most n_tiles*8 - 1 rows.
    def tile_rows(n):
        return _round_up(pl.cdiv(B, n), SUBLANE)

    n_tiles = 2
    max_tiles = max(2, pl.cdiv(B, SUBLANE))
    while (n_tiles < max_tiles and
           2 * tile_rows(n_tiles) * per_row_bytes + 2 * weight_bytes > budget):
        n_tiles += 2
    tile_b = tile_rows(n_tiles)
    Bp = tile_b * n_tiles

    if Bp != B:
        x = jnp.pad(x, ((0, Bp - B), (0, 0)))   # tiny (< n_tiles*8 rows)

    # TODO(synk): for very large I/H/O, add pipeline_mode=pl.Buffered(1) on the
    # weight/bias specs (constant index_map) and set vmem_limit_bytes.
    out = pl.pallas_call(
        mlp_kernel,
        out_shape=jax.ShapeDtypeStruct((Bp, O), dtype),
        grid_spec=pltpu.PrefetchScalarGridSpec(
            num_scalar_prefetch=0,
            grid=(n_tiles,),
            in_specs=[
                pl.BlockSpec((tile_b, I), lambda i: (i, 0)),   # x tiles
                pl.BlockSpec((I, Hp), lambda i: (0, 0)),       # w1 resident
                pl.BlockSpec((1, Hp), lambda i: (0, 0)),       # b1 resident
                pl.BlockSpec((Hp, O), lambda i: (0, 0)),       # w2 resident
                pl.BlockSpec((1, O), lambda i: (0, 0)),        # b2 resident
            ],
            out_specs=pl.BlockSpec((tile_b, O), lambda i: (i, 0)),
        ),
        compiler_params=pltpu.CompilerParams(
            dimension_semantics=("parallel",)),
        cost_estimate=cost,
    )(x, w1, b1, w2, b2)

    return out[:B] if Bp != B else out


def init_params(key, num_input, num_hidden, num_output, dtype=jnp.float32):
    """Deterministic init mimicking torch nn.Linear default (uniform +/- 1/sqrt(fan_in))."""
    k1, k2, k3, k4 = jax.random.split(key, 4)
    lim1 = 1.0 / jnp.sqrt(jnp.asarray(num_input, dtype))
    lim2 = 1.0 / jnp.sqrt(jnp.asarray(num_hidden, dtype))
    # Stored already transposed relative to torch's [out, in] layout.
    w1 = jax.random.uniform(k1, (num_input, num_hidden), dtype, -lim1, lim1)
    b1 = jax.random.uniform(k2, (1, num_hidden), dtype, -lim1, lim1)
    w2 = jax.random.uniform(k3, (num_hidden, num_output), dtype, -lim2, lim2)
    b2 = jax.random.uniform(k4, (1, num_output), dtype, -lim2, lim2)
    return w1, b1, w2, b2


def _ref_forward(x, w1, b1, w2, b2):
    return jnp.maximum(x @ w1 + b1, 0.0) @ w2 + b2


if __name__ == "__main__":
    key = jax.random.PRNGKey(0)
    num_input, num_hidden, num_output = 64, 32, 10

    kx, kp, kx2 = jax.random.split(key, 3)
    w1, b1, w2, b2 = init_params(kp, num_input, num_hidden, num_output)
    # One-time param prep (hoisted out of the forward path).
    pw1, pb1, pw2, pb2 = prepare_params(w1, b1, w2, b2)

    # Small batch: exercises the grid-free, fully VMEM-resident path.
    B_small = 8
    x_small = jax.random.normal(kx, (B_small, num_input), jnp.float32)
    out_small = jax.block_until_ready(
        neural_net_forward(x_small, pw1, pb1, pw2, pb2))
    ref_small = _ref_forward(x_small, w1, b1, w2, b2)
    assert out_small.shape == (B_small, num_output)
    assert jnp.allclose(out_small, ref_small, atol=1e-5, rtol=1e-5)

    # Larger batch: force the batch-tiled "parallel" grid path (even grid,
    # sublane-aligned tiles, minimal batch padding).
    B_big = 600
    x_big = jax.random.normal(kx2, (B_big, num_input), jnp.float32)
    out_big = jax.block_until_ready(
        neural_net_forward(x_big, pw1, pb1, pw2, pb2, gridfree_row_limit=256))
    ref_big = _ref_forward(x_big, w1, b1, w2, b2)
    assert out_big.shape == (B_big, num_output)
    assert jnp.allclose(out_big, ref_big, atol=1e-5, rtol=1e-5)

    print("KERNEL_OK")
</pallas_src>

<mosaic_0001>
module attributes {stable_mosaic.version = 11 : i64} {
  func.func @mlp_kernel(%arg0: memref<8x64xf32, #tpu.memory_space<vmem>>, %arg1: memref<64x128xf32, #tpu.memory_space<vmem>>, %arg2: memref<1x128xf32, #tpu.memory_space<vmem>>, %arg3: memref<128x10xf32, #tpu.memory_space<vmem>>, %arg4: memref<1x10xf32, #tpu.memory_space<vmem>>, %arg5: memref<8x10xf32, #tpu.memory_space<vmem>>) attributes {dimension_semantics = [], scalar_prefetch = 0 : i64, scratch_operands = 0 : i64, tpu.core_type = #tpu.core_type<tc>} {
    %c0 = arith.constant 0 : index
    %c0_0 = arith.constant 0 : index
    %0 = vector.load %arg0[%c0, %c0_0] : memref<8x64xf32, #tpu.memory_space<vmem>>, vector<8x64xf32>
    %c0_1 = arith.constant 0 : index
    %c0_2 = arith.constant 0 : index
    %1 = vector.load %arg1[%c0_1, %c0_2] : memref<64x128xf32, #tpu.memory_space<vmem>>, vector<64x128xf32>
    %cst = arith.constant dense<0.000000e+00> : vector<8x128xf32>
    %2 = tpu.matmul %0, %1, %cst {dimension_numbers = #tpu.dot_dimension_numbers<[1], [0], [0], [1], [0, 0, 1, 1], [], []>} : vector<8x64xf32>, vector<64x128xf32>, vector<8x128xf32> -> vector<8x128xf32>
    %c0_3 = arith.constant 0 : index
    %c0_4 = arith.constant 0 : index
    %3 = vector.load %arg2[%c0_3, %c0_4] : memref<1x128xf32, #tpu.memory_space<vmem>>, vector<1x128xf32>
    %4 = vector.broadcast %3 : vector<1x128xf32> to vector<8x128xf32>
    %5 = arith.addf %2, %4 : vector<8x128xf32>
    %cst_5 = arith.constant 0.000000e+00 : f32
    %6 = vector.broadcast %cst_5 : f32 to vector<8x128xf32>
    %7 = arith.maximumf %5, %6 : vector<8x128xf32>
    %c0_6 = arith.constant 0 : index
    %c0_7 = arith.constant 0 : index
    %8 = vector.load %arg3[%c0_6, %c0_7] : memref<128x10xf32, #tpu.memory_space<vmem>>, vector<128x10xf32>
    %cst_8 = arith.constant dense<0.000000e+00> : vector<8x10xf32>
    %9 = tpu.matmul %7, %8, %cst_8 {dimension_numbers = #tpu.dot_dimension_numbers<[1], [0], [0], [1], [0, 0, 1, 1], [], []>} : vector<8x128xf32>, vector<128x10xf32>, vector<8x10xf32> -> vector<8x10xf32>
    %c0_9 = arith.constant 0 : index
    %c0_10 = arith.constant 0 : index
    %10 = vector.load %arg4[%c0_9, %c0_10] : memref<1x10xf32, #tpu.memory_space<vmem>>, vector<1x10xf32>
    %11 = vector.broadcast %10 : vector<1x10xf32> to vector<8x10xf32>
    %12 = arith.addf %9, %11 : vector<8x10xf32>
    %c0_11 = arith.constant 0 : index
    %c0_12 = arith.constant 0 : index
    %13 = vector.load %arg5[%c0_11, %c0_12] : memref<8x10xf32, #tpu.memory_space<vmem>>, vector<8x10xf32>
    tpu.vector_store %arg5[%c0_11, %c0_12], %12 {strides = array<i32>} : memref<8x10xf32, #tpu.memory_space<vmem>>, vector<8x10xf32>,
    return
  }
}

</mosaic_0001>

<bundles_post_ra>
// kernel: tpu_custom_call.1
= control target key start
LH: loop header
LB: loop body
LE: loop exit
PB: predicated region body
PF: predicated region fallthrough
CT: control target
= control target key end

     0   :  { %v368_v3 = vmov 0.0|0.0   ;;  %vm369_vm0 = vmmov 0   ;;  %v370_v6 = vmov 0.0   ;;  %s495_s0 = inlined_call_operand.vmem [shape: f32[8,64], index: 0, kind: input, shape index: {}]   ;;  %s496_s1 = inlined_call_operand.vmem [shape: f32[64,128], index: 1, kind: input, shape index: {}]   ;;  %s497_s2 = inlined_call_operand.vmem [shape: f32[1,128], index: 2, kind: input, shape index: {}]   ;;  %s498_s3 = inlined_call_operand.vmem [shape: f32[128,10], index: 3, kind: input, shape index: {}]   ;;  %s499_s4 = inlined_call_operand.vmem [shape: f32[1,10], index: 4, kind: input, shape index: {}]   ;;  %s500_s5 = inlined_call_operand.hbm [shape: f32[8,10], index: 5, kind: output, shape index: {}]  }
   0x1   :  { %v22_v0 = vld [vmem:[%s496_s1] sm:$0xff]  ;;  %v23_v1 = vld [vmem:[%s496_s1 + $0x8] sm:$0xff]  ;;  %v24_v2 = vld [vmem:[%s496_s1 + $0x10] sm:$0xff]  ;;  %304 = vmatprep.subr.bf16.mxu0 %v368_v3  ;;  %266 = vmatprep.mubr.msk.f32.mxu0 %vm369_vm0, %v370_v6 }
   0x2   :  { %v305_v4 = vpack.c.bf16 %v23_v1, %v22_v0  ;;  %v25_v5 = vld [vmem:[%s496_s1 + $0x18] sm:$0xff]  ;;  %316 = vmatprep.subr.bf16.mxu1 %v368_v3  ;;  %301 = vmatprep.mubr.msk.f32.mxu1 %vm369_vm0, %v370_v6  ;;  %v112_v8 = vld [vmem:[%s498_s3] sm:$0xff]  ;;  %v113_v9 = vld [vmem:[%s498_s3 + $0x8] sm:$0xff] }
   0x3   :  { %v308_v7 = vpack.c.bf16 %v25_v5, %v24_v2  ;;  %v114_v10 = vld [vmem:[%s498_s3 + $0x10] sm:$0xff]  ;;  %v26_v11 = vld [vmem:[%s496_s1 + $0x20] sm:$0xff]  ;;  %v27_v12 = vld [vmem:[%s496_s1 + $0x28] sm:$0xff]  ;;  %v317_v13 = vpack.c.bf16 %v113_v9, %v112_v8 }
   0x4   :  { %306 = vmatpush3.bf16.msra.mxu0 %v305_v4  ;;  %v115_v14 = vld [vmem:[%s498_s3 + $0x18] sm:$0xff]  ;;  %v311_v16 = vpack.c.bf16 %v27_v12, %v26_v11  ;;  %v116_v17 = vld [vmem:[%s498_s3 + $0x20] sm:$0xff]  ;;  %v117_v18 = vld [vmem:[%s498_s3 + $0x28] sm:$0xff] }
   0x5   :  { %307 = vmatprep.subr.bf16.mxu0 %v368_v3  ;;  %318 = vmatpush3.bf16.msra.mxu1 %v317_v13  ;;  %v320_v15 = vpack.c.bf16 %v115_v14, %v114_v10  ;;  %v28_v19 = vld [vmem:[%s496_s1 + $0x30] sm:$0xff]  ;;  %v29_v20 = vld [vmem:[%s496_s1 + $0x38] sm:$0xff] }
   0x6   :  { %319 = vmatprep.subr.bf16.mxu1 %v368_v3 }
   0x8   :  { %309 = vmatpush3.bf16.msra.mxu0 %v308_v7 }
   0x9   :  { %310 = vmatprep.subr.bf16.mxu0 %v368_v3 }
   0xa   :  { %10 = vsyncpa [#allocation3], 0  ;;  %321 = vmatpush3.bf16.msra.mxu1 %v320_v15  ;;  %v323_v21 = vpack.c.bf16 %v117_v18, %v116_v17  ;;  %v314_v22 = vpack.c.bf16 %v29_v20, %v28_v19  ;;  %v118_v23 = vld [vmem:[%s498_s3 + $0x30] sm:$0xff]  ;;  %v119_v24 = vld [vmem:[%s498_s3 + $0x38] sm:$0xff]  ;;  %vm37_vm1 = vcmask 523264   ;;  %s371_s20 = smov [#allocation2]  }
   0xb   :  { %322 = vmatprep.subr.bf16.mxu1 %v368_v3  ;;  %v326_v25 = vpack.c.bf16 %v119_v24, %v118_v23  ;;  %v21_v26 = vld [vmem:[%s495_s0] sm:$0xff]  ;;  %v121_v28 = vld [vmem:[%s498_s3 + $0x48] sm:$0xff]  ;;  %v122_v30 = vld [vmem:[%s498_s3 + $0x50] sm:$0xff]  ;;  %s213_s21 = sshll.u32 %s371_s20, 4  ;;  %vm205_vm2 = vcmask 80896   ;;  %s214_s21 = int_to_ptr.vmem [resolvable:$true] %s213_s21 }
   0xc   :  { %312 = vmatpush3.bf16.msra.mxu0 %v311_v16  ;;  %v120_v27 = vld [vmem:[%s498_s3 + $0x40] sm:$0xff]  ;;  %v123_v31 = vld [vmem:[%s498_s3 + $0x58] sm:$0xff]  ;;  %v125_v34 = vld [vmem:[%s498_s3 + $0x68] sm:$0xff]  ;;  %p349_p1 = scmp.lt.s32.totalorder %s214_s21, %s214_s21 }
   0xd   :  { %313 = vmatprep.subr.bf16.mxu0 %v368_v3  ;;  %v329_v29 = vpack.c.bf16 %v121_v28, %v120_v27  ;;  %v332_v32 = vpack.c.bf16 %v123_v31, %v122_v30  ;;  %v124_v33 = vld [vmem:[%s498_s3 + $0x60] sm:$0xff]  ;;  %v126_v36 = vld [vmem:[%s498_s3 + $0x70] sm:$0xff]  ;;  %v127_v37 = vld [vmem:[%s498_s3 + $0x78] sm:$0xff]  ;;  %s344_s3 = scalar_lea.vmem %s214_s21, 128 }
   0xe   :  { %324 = vmatpush3.bf16.msra.mxu1 %v323_v21  ;;  %v335_v35 = vpack.c.bf16 %v125_v34, %v124_v33  ;;  %v338_v38 = vpack.c.bf16 %v127_v37, %v126_v36  ;;  %v221_v39 = vld [vmem:[%s497_s2] ss:$0 sm:$0xff]  ;;  %p345_p0 = scmp.ne.s32.totalorder %s214_s21, %s344_s3  ;;  %p350_p2 = scmp.lt.s32.totalorder %s344_s3, %s344_s3 }
   0xf   :  { %325 = vmatprep.subr.bf16.mxu1 %v368_v3  ;;  %v223_v44 = vld [vmem:[%s499_s4] ss:$0 sm:$0xff] }
  0x10   :  { %315 = vmatpush3.bf16.msra.mxu0 %v314_v22  ;;  %p351_p3 = por %p350_p2, %p349_p1 }
  0x12   :  { %327 = vmatpush3.bf16.msra.mxu1 %v326_v25  ;;  %p352_p4 = pnand %p351_p3, %p345_p0 }
  0x13   :  { %267 = vmatmul.mubr.msk.f32.vlgmr.msra.gmra.mrb[0].mxu0 %vm37_vm1, %v21_v26  ;;  %328 = vmatprep.subr.bf16.mxu1 %v368_v3 }
  0x16   :  { %330 = vmatpush3.bf16.msra.mxu1 %v329_v29 }
  0x17   :  { %331 = vmatprep.subr.bf16.mxu1 %v368_v3 }
  0x1a   :  { %333 = vmatpush3.bf16.msra.mxu1 %v332_v32 }
  0x1b   :  { %334 = vmatprep.subr.bf16.mxu1 %v368_v3 }
  0x1e   :  { %336 = vmatpush3.bf16.msra.mxu1 %v335_v35 }
  0x1f   :  { %337 = vmatprep.subr.bf16.mxu1 %v368_v3 }
  0x22   :  { %339 = vmatpush3.bf16.msra.mxu1 %v338_v38 }
  0xe6   :  { %v107_v40 = vpop.f32.mrb[0].mxu0 }
  0xe7   :  { %v108_v41 = vadd.f32 %v221_v39, %v107_v40  ;;  %v268_v42 = vpop.f32.mrb[1].mxu0 }
  0xe9   :  { %v111_v43 = vmax.f32 %v108_v41, 0.0 }
  0xeb   :  { %302 = vmatmul.mubr.f32.vlgmr.msra.gmra.mrb[0].mxu1 %v111_v43 }
 0x1be   :  { %v201_v45 = vpop.f32.mrb[0].mxu1 }
 0x1bf   :  { %v202_v46 = vadd.f32 %v223_v44, %v201_v45  ;;  %v303_v47 = vpop.f32.mrb[1].mxu1 }
 0x1c1   :  { %206 = vst.msk [vmem:[#allocation2] sm:$0xff] %vm205_vm2, %v202_v46 }
 0x1c2   :  { %355 = shalt.err (!%p352_p4)
}
 0x1c3   :  { %s356_s23 = scalar_lea.hbm %s500_s5, 128 }
 0x1c4   :  { %p357_p5 = scmp.ne.s32.totalorder %s500_s5, %s356_s23  ;;  %p360_p6 = scmp.lt.u32.totalorder %s356_s23, %s500_s5 }
 0x1c6   :  { %p362_p7 = pnand %p360_p6, %p357_p5 }
 0x1c8   :  { %365 = shalt.err (!%p362_p7)
}
 0x1c9   :  { %216 = dma.vmem_to_hbm [thread:$0]  %s214_s21, 128, %s500_s5, [#allocation3]  }
 0x1ca   :  { %366 = dma.done.wait [#allocation3], 128  }
 0x1cb   :  { %367 = vsyncadd [#allocation3], 4294967168 }
 0x1cc   :  { %220 = vsyncpa [#allocation3], 1 }

</bundles_post_ra>
